<compile_context>
chip_gen: v7x
topology: tpu7x:2x2x1
jax: 0.10.0
libtpu: 0.0.40
codegen_flags: <defaults>
</compile_context>

<pallas_src>
import functools
import math

import jax
import jax.numpy as jnp
from jax.experimental import pallas as pl
from jax.experimental.pallas import tpu as pltpu


def make_positional_encoding_table(max_len: int, d_model: int, dtype=jnp.float32):
    """Deterministic construction of the `pe` buffer (matches torch __init__)."""
    position = jnp.arange(max_len, dtype=jnp.float32)[:, None]                 # (max_len, 1)
    div_term = jnp.exp(
        jnp.arange(0, d_model, 2, dtype=jnp.float32) * (-math.log(10000.0) / d_model)
    )                                                                          # (d_model//2,)
    angles = position * div_term                                               # (max_len, d//2)
    pe = jnp.zeros((max_len, d_model), dtype=jnp.float32)
    pe = pe.at[:, 0::2].set(jnp.sin(angles))
    pe = pe.at[:, 1::2].set(jnp.cos(angles))
    return pe.astype(dtype)


def _pe_add_kernel(x_ref, pe_ref, o_ref, *, batch):
    # x_ref : (ts, B*D) lane-dense tile;  pe_ref : (ts, D)
    pe_full = jnp.tile(pe_ref[...], (1, batch))            # (ts, D) -> (ts, B*D)
    o_ref[...] = (x_ref[...] + pe_full).astype(o_ref.dtype)


def _pe_add_dropout_kernel(x_ref, pe_ref, bits_ref, o_ref, *, batch, p):
    # Inverted dropout: keep-prob = 1 - p, scale kept elements by 1/(1-p).
    pe_full = jnp.tile(pe_ref[...], (1, batch))            # (ts, D) -> (ts, B*D)
    y = x_ref[...] + pe_full
    # Integer-threshold compare on raw uint32 bits (no float convert needed).
    threshold = jnp.uint32(min(int(round(p * 4294967296.0)), 4294967295))
    keep = bits_ref[...] >= threshold
    scale = jnp.asarray(1.0 / (1.0 - p), dtype=y.dtype)
    o_ref[...] = jnp.where(keep, y * scale, jnp.zeros_like(y)).astype(o_ref.dtype)


def positional_encoding_forward(x, pe_table, *, dropout_p=0.1, training=True,
                                rng_key=None, seq_tile=None):
    """out = dropout(x + pe[:S]);  x: [S, B, D] -> [S, B, D]."""
    S, B, D = x.shape
    if S > pe_table.shape[0]:
        raise ValueError("sequence length exceeds max_len of the PE table")

    # Lane/sublane-dense 2D layout (free contiguous view): [S, B*D].
    xf = x.reshape(S, B * D)
    pe = pe_table[:S].astype(x.dtype)                       # (S, D), dtype-matched

    itemsize = jnp.dtype(x.dtype).itemsize
    row_bytes = B * D * itemsize

    # ---- tile selection: big blocks (~1 MiB), sublane-aligned, >= 2 grid steps ----
    if seq_tile is None:
        seq_tile = min(512, max(8, (1 << 20) // max(row_bytes, 1)))
    seq_tile = max(8, (int(seq_tile) // 8) * 8)             # multiple of 8 sublanes
    if S >= 16:
        # Keep at least 2 grid steps so both v7x TensorCores get sharded work.
        half = (((S + 1) // 2) + 7) // 8 * 8
        seq_tile = min(seq_tile, half)
    seq_tile = min(seq_tile, ((S + 7) // 8) * 8)            # don't exceed (padded) S

    num_tiles = pl.cdiv(S, seq_tile)
    S_pad = num_tiles * seq_tile
    if S_pad != S:                                          # pad the tail, slice back later
        xf = jnp.pad(xf, ((0, S_pad - S), (0, 0)))
        pe = jnp.pad(pe, ((0, S_pad - S), (0, 0)))

    apply_dropout = bool(training) and float(dropout_p) > 0.0

    # ---- VMEM budget: double-buffered blocks + headroom ----
    block_bytes = 2 * seq_tile * B * D * itemsize           # x block + out block
    block_bytes += seq_tile * D * itemsize                  # pe block
    if apply_dropout:
        block_bytes += seq_tile * B * D * 4                 # uint32 bits block
    vmem_limit = int(min(max(2 * block_bytes + (4 << 20), 16 << 20), 64 << 20))

    xbd_spec = pl.BlockSpec((seq_tile, B * D), lambda i: (i, 0))
    pe_spec = pl.BlockSpec((seq_tile, D), lambda i: (i, 0))
    compiler_params = pltpu.CompilerParams(
        dimension_semantics=("parallel",),
        vmem_limit_bytes=vmem_limit,
    )
    out_shape = jax.ShapeDtypeStruct((S_pad, B * D), x.dtype)

    if apply_dropout:
        if rng_key is None:
            rng_key = jax.random.PRNGKey(0)
        # TODO(synk): pltpu.prng_random_bits would avoid this extra HBM stream, but it
        # has no interpret-mode lowering; host-generated bits keep the kernel portable.
        bits = jax.random.bits(rng_key, (S_pad, B * D), dtype=jnp.uint32)
        kernel = functools.partial(_pe_add_dropout_kernel, batch=B, p=float(dropout_p))
        out = pl.pallas_call(
            kernel,
            out_shape=out_shape,
            grid=(num_tiles,),
            in_specs=[xbd_spec, pe_spec, xbd_spec],
            out_specs=xbd_spec,
            compiler_params=compiler_params,
        )(xf, pe, bits)
    else:
        kernel = functools.partial(_pe_add_kernel, batch=B)
        out = pl.pallas_call(
            kernel,
            out_shape=out_shape,
            grid=(num_tiles,),
            in_specs=[xbd_spec, pe_spec],
            out_specs=xbd_spec,
            compiler_params=compiler_params,
        )(xf, pe)

    return out[:S].reshape(S, B, D)


if __name__ == "__main__":
    # Shapes consistent with the forward contract: [seq, batch, d_model].
    S, B, D = 256, 2, 128
    MAX_LEN = 512
    P = 0.1

    key = jax.random.PRNGKey(0)
    kx, kdrop = jax.random.split(key)
    x = jax.random.normal(kx, (S, B, D), dtype=jnp.float32)
    pe_table = make_positional_encoding_table(MAX_LEN, D)
    ref = x + pe_table[:S][:, None, :]

    # Eval mode (dropout = identity): exact check against a pure-JAX reference.
    out_eval = jax.block_until_ready(
        positional_encoding_forward(x, pe_table, dropout_p=P, training=False))
    assert out_eval.shape == (S, B, D)
    assert jnp.allclose(out_eval, ref, atol=1e-6, rtol=1e-6)

    # Training mode: fused inverted dropout.
    out_train = jax.block_until_ready(
        positional_encoding_forward(x, pe_table, dropout_p=P, training=True, rng_key=kdrop))
    assert out_train.shape == (S, B, D)
    scaled = ref * (1.0 / (1.0 - P))
    close = jnp.isclose(out_train, scaled, atol=1e-5, rtol=1e-5)
    zero = out_train == 0.0
    assert bool(jnp.all(close | zero))
    drop_frac = float(jnp.mean(zero.astype(jnp.float32)))
    assert 0.05 < drop_frac < 0.15, f"unexpected drop fraction {drop_frac}"

    # Ragged sequence length (exercises the padded-tail path, no divisibility assert).
    S2 = 200
    x2 = jax.random.normal(kx, (S2, B, D), dtype=jnp.float32)
    out2 = jax.block_until_ready(
        positional_encoding_forward(x2, pe_table, dropout_p=P, training=False))
    ref2 = x2 + pe_table[:S2][:, None, :]
    assert jnp.allclose(out2, ref2, atol=1e-6, rtol=1e-6)

    print("KERNEL_OK")
</pallas_src>

<mosaic_0001>
module attributes {stable_mosaic.version = 11 : i64} {
  func.func @_pe_add_kernel(%arg0: i32, %arg1: memref<128x256xf32, #tpu.memory_space<vmem>>, %arg2: memref<128x128xf32, #tpu.memory_space<vmem>>, %arg3: memref<128x256xf32, #tpu.memory_space<vmem>>) attributes {dimension_semantics = [#tpu.dimension_semantics<parallel>], iteration_bounds = array<i64: 2>, scalar_prefetch = 0 : i64, scratch_operands = 0 : i64, tpu.core_type = #tpu.core_type<tc>, window_params = [{transform_indices = @transform_0, window_bounds = array<i64: 128, 256>}, {transform_indices = @transform_1, window_bounds = array<i64: 128, 128>}, {transform_indices = @transform_2, window_bounds = array<i64: 128, 256>}]} {
    %c0 = arith.constant 0 : index
    %c0_0 = arith.constant 0 : index
    %0 = vector.load %arg2[%c0, %c0_0] : memref<128x128xf32, #tpu.memory_space<vmem>>, vector<128x128xf32>
    %1 = tpu.concatenate %0, %0 in 1 : vector<128x128xf32>, vector<128x128xf32> -> vector<128x256xf32>
    %c0_1 = arith.constant 0 : index
    %c0_2 = arith.constant 0 : index
    %2 = vector.load %arg1[%c0_1, %c0_2] : memref<128x256xf32, #tpu.memory_space<vmem>>, vector<128x256xf32>
    %3 = arith.addf %2, %1 : vector<128x256xf32>
    %c0_3 = arith.constant 0 : index
    %c0_4 = arith.constant 0 : index
    %4 = vector.load %arg3[%c0_3, %c0_4] : memref<128x256xf32, #tpu.memory_space<vmem>>, vector<128x256xf32>
    tpu.vector_store %arg3[%c0_3, %c0_4], %3 {strides = array<i32>} : memref<128x256xf32, #tpu.memory_space<vmem>>, vector<128x256xf32>,
    return
  }
  func.func @transform_0(%arg0: i32) -> (i32, i32) {
    %c0_i32 = arith.constant 0 : i32
    %c0_i32_0 = arith.constant 0 : i32
    return %arg0, %c0_i32 : i32, i32
  }
  func.func @transform_1(%arg0: i32) -> (i32, i32) {
    %c0_i32 = arith.constant 0 : i32
    %c0_i32_0 = arith.constant 0 : i32
    return %arg0, %c0_i32 : i32, i32
  }
  func.func @transform_2(%arg0: i32) -> (i32, i32) {
    %c0_i32 = arith.constant 0 : i32
    %c0_i32_0 = arith.constant 0 : i32
    return %arg0, %c0_i32 : i32, i32
  }
}

</mosaic_0001>

<bundles_post_ra>
// kernel: tpu_custom_call.1
= control target key start
LH: loop header
LB: loop body
LE: loop exit
PB: predicated region body
PF: predicated region fallthrough
CT: control target
= control target key end

     0   :  { %7 = vsyncpa [#allocation3], 0  ;;  %s966_s0 = inlined_call_operand.hbm [shape: f32[256,256], index: 0, kind: input, shape index: {}]   ;;  %s967_s1 = inlined_call_operand.hbm [shape: f32[256,128], index: 1, kind: input, shape index: {}]   ;;  %s968_s2 = inlined_call_operand.hbm [shape: f32[256,256], index: 2, kind: output, shape index: {}]  }
   0x1   :  { %9 = vsyncpa [#allocation3 + $0x1], 0 }
   0x2   :  { %10 = vsyncpa [#allocation6], 0 }
   0x3   :  { %12 = vsyncpa [#allocation6 + $0x1], 0 }
   0x4   :  { %13 = vsyncpa [#allocation4], 0 }
   0x5   :  { %15 = vsyncpa [#allocation4 + $0x1], 0  ;;  %s667_s9 = smov 0   ;;  %s669_s10 = smov 0  }
   0x6   :  { %s671_s11 = smov 0   ;;  %s673_s12 = smov 0  }
   0x7 LB: > { %s688_s13 = sadd.s32 4294967295, %s641_s12   ;;  %s429_s14 = sadd.s32 4294967294, %s641_s12   ;;  %s641_s12 = sphi %s673_s12, %s984_s12   ;;  %s637_s11 = sphi %s671_s11, %s983_s11   ;;  %s633_s10 = sphi %s669_s10, %s982_s10   ;;  %s629_s9 = sphi %s667_s9, %s981_s9  }
   0x8   : > { %s692_s15 = sadd.s32 1, %s641_s12   ;;  %s28_s16 = sadd.s32 1, %s637_s11 }
   0x9   : > { %s25_s17 = ssub.s32 %s641_s12, %s692_s15  ;;  %p35_p0 = scmp.ne.s32.totalorder %s637_s11, %s633_s10 }
   0xa   : > { %p26_p1 = scmp.eq.s32.totalorder %s25_s17, 0  ;;  %p36_p2 = scmp.eq.s32.totalorder %s641_s12, 0 }
   0xb   : > { %p41_p3 = scmp.ne.s32.totalorder %s633_s10, %s629_s9  ;;  %p42_p4 = scmp.eq.s32.totalorder %s688_s13, 0 }
   0xc   : > { %s704_s18 = scalar_select %p26_p1, %s637_s11, %s28_s16  }
   0xd   : > { %p706_p5 = por %p36_p2, %p35_p0  ;;  %p710_p6 = por %p42_p4, %p41_p3 }
   0xe   : > { %p91_p7 = scmp.eq.s32.totalorder %s688_s13, 1  ;;  %p97_p8 = scmp.eq.s32.totalorder %s429_s14, 1 }
   0xf   : > { %s972_s20 = scalar_select %p710_p6, 1, 0 }
  0x10   : > { %p471_p10 = scmp.lt.s32.totalorder %s641_s12, 2  ;;  %p717_p11 = por %p91_p7, %p35_p0 }
  0x11   : > { %p721_p12 = por %p97_p8, %p41_p3  ;;  %s726_s23 = sand.u32 1, %s637_s11  }
  0x12   : > { %s973_s21 = scalar_select %p717_p11, 1, 0 }
  0x13   : > { %s974_s22 = scalar_select %p721_p12, 1, 0 }
  0x14   : > { %s450_s24 = sshll.u32 %s641_s12, 12  ;;  %s432_s25 = sshll.u32 %s726_s23, 8 }
  0x15   : > { %s733_s28 = scalar_lea.hbm %s966_s0, %s450_s24  ;;  %s121_s29 = scalar_lea.vmem [#allocation2], %s432_s25 }
  0x16   : > { %s129_s30 = sshll.u32 %s121_s29, 4  ;;  %p737_p13 = pnand %p471_p10, %p706_p5  ;;  %s741_s30 = int_to_ptr.vmem [resolvable:$true] %s129_s30 }
  0x17   : > { %s118_s4 = scalar_lea.sflag [#allocation3], %s726_s23  ;;  %s511_s5 = scalar_lea.hbm %s733_s28, 4096 }
  0x18   : > { %p512_p0 = scmp.ne.s32.totalorder %s733_s28, %s511_s5  ;;  %p513_p1 = pneg %p737_p13 }
  0x19   : > { %s516_s8 = scalar_lea.hbm %s966_s0, 8192  ;;  %p517_p4 = scmp.lt.u32.totalorder %s733_s28, %s966_s0 }
  0x1a   : > { %p514_p2 = pnand %p513_p1, %p512_p0  ;;  %p518_p5 = scmp.lt.u32.totalorder %s516_s8, %s511_s5 }
  0x1b   : > { %p520_p8 = scmp.lt.u32.totalorder %s511_s5, %s733_s28 }
  0x1c   : > { %p515_p3 = pneg %p514_p2  ;;  %p519_p7 = por %p518_p5, %p517_p4 }
  0x1e   : > { %p521_p10 = por %p520_p8, %p519_p7 }
  0x20   : > { %p522_p9 = pnand %p521_p10, %p515_p3 }
  0x22   : > { %525 = shalt.err (!%p522_p9)
}
  0x23   : > { %s526_s17 = scalar_lea.vmem %s741_s30, 4096  ;;  %s643_s19 = smov [#allocation2]  }
  0x24   : > { %p527_p0 = scmp.ne.s32.totalorder %s741_s30, %s526_s17  ;;  %s531_s24 = sshll.u32 %s643_s19, 4  ;;  %s532_s24 = int_to_ptr.vmem [resolvable:$false] %s531_s24 }
  0x25   : > { %s533_s25 = scalar_lea.vmem %s532_s24, 8192  ;;  %p534_p11 = scmp.lt.s32.totalorder %s741_s30, %s532_s24 }
  0x26   : > { %p529_p2 = pnand %p527_p0, %p513_p1  ;;  %p535_p4 = scmp.lt.s32.totalorder %s533_s25, %s526_s17 }
  0x28   : > { %p530_p12 = pneg %p529_p2  ;;  %p536_p5 = por %p535_p4, %p534_p11 }
  0x2a   : > { %p537_p7 = pnand %p536_p5, %p530_p12 }
  0x2c   : > { %540 = shalt.err (!%p537_p7)
}
  0x2d   : > { %s644_s26 = smov 256   ;;  %s645_s27 = smov 16  }
  0x2e   : > { %463 = dma.hbm_to_vmem [thread:$0]  (!%p737_p13), %s733_s28, 4096, %s741_s30, %s118_s4, %s644_s26, %s644_s26, %s645_s27  }
  0x2f   : > { %p439_p9 = scmp.ge.s32.totalorder %s641_s12, 1  ;;  %p158_p3 = scmp.lt.s32.totalorder %s641_s12, 3 }
  0x30   : > { %s436_s29 = sshll.u32 %s726_s23, 7  ;;  %s451_s6 = sshll.u32 %s641_s12, 11 }
  0x31   : > { %p774_p11 = pnand %p439_p9, %p158_p3  ;;  %s143_s7 = scalar_lea.vmem [#allocation5], %s436_s29 }
  0x32   : > { %s150_s8 = sshll.u32 %s143_s7, 4  ;;  %s782_s17 = scalar_lea.hbm %s967_s1, %s451_s6  ;;  %s784_s8 = int_to_ptr.vmem [resolvable:$true] %s150_s8 }
  0x33   : > { %s140_s28 = scalar_lea.sflag [#allocation6], %s726_s23  ;;  %s541_s30 = scalar_lea.hbm %s782_s17, 2048 }
  0x34   : > { %p542_p12 = scmp.ne.s32.totalorder %s782_s17, %s541_s30  ;;  %s546_s24 = scalar_lea.hbm %s967_s1, 4096 }
  0x35   : > { %p547_p0 = scmp.lt.u32.totalorder %s782_s17, %s967_s1  ;;  %p548_p2 = scmp.lt.u32.totalorder %s546_s24, %s541_s30 }
  0x36   : > { %p544_p8 = pnand %p542_p12, %p513_p1  ;;  %p550_p5 = scmp.lt.u32.totalorder %s541_s30, %s782_s17 }
  0x37   : > { %p549_p4 = por %p548_p2, %p547_p0 }
  0x38   : > { %p545_p10 = pneg %p544_p8 }
  0x39   : > { %p551_p7 = por %p550_p5, %p549_p4 }
  0x3b   : > { %p552_p9 = pnand %p551_p7, %p545_p10 }
  0x3d   : > { %555 = shalt.err (!%p552_p9)
}
  0x3e   : > { %s556_s27 = scalar_lea.vmem %s784_s8, 2048  ;;  %s646_s29 = smov [#allocation5]  }
  0x3f   : > { %p557_p3 = scmp.ne.s32.totalorder %s784_s8, %s556_s27  ;;  %s561_s6 = sshll.u32 %s646_s29, 4  ;;  %s562_s6 = int_to_ptr.vmem [resolvable:$false] %s561_s6 }
  0x40   : > { %s563_s7 = scalar_lea.vmem %s562_s6, 4096  ;;  %p564_p6 = scmp.lt.s32.totalorder %s784_s8, %s562_s6 }
  0x41   : > { %p559_p12 = pnand %p557_p3, %p513_p1  ;;  %p565_p0 = scmp.lt.s32.totalorder %s563_s7, %s556_s27 }
  0x43   : > { %p560_p8 = pneg %p559_p12  ;;  %p566_p2 = por %p565_p0, %p564_p6 }
  0x45   : > { %p567_p4 = pnand %p566_p2, %p560_p8 }
  0x47   : > { %570 = shalt.err (!%p567_p4)
}
  0x48   : > { %s647_s14 = smov 128   ;;  %s648_s16 = smov 8  }
  0x49   : > { %466 = dma.hbm_to_vmem [thread:$0]  (!%p737_p13), %s782_s17, 2048, %s784_s8, %s140_s28, %s647_s14, %s647_s14, %s648_s16  }
  0x4a   : > { %162 = sbr.rel (%p774_p11) target bundleno = 122 (0x7a), region = 28  ;;  %s815_s30 = sand.u32 (!%p774_p11), 1, %s633_s10  }
  0x4b   : > { %s440_s4 = sshll.u32 (!%p774_p11), %s815_s30, 8  ;;  %s165_s19 = scalar_lea.sflag (!%p774_p11), [#allocation3], %s815_s30 }
  0x4c   : > { %s819_s24 = scalar_lea.vmem (!%p774_p11), [#allocation2], %s440_s4  ;;  %p977_p6 = scmp.ne.s32.totalorder (!%p774_p11), %s972_s20, 0 }
  0x51   : > { %616 = dma.done.wait (%p977_p6), %s165_s19, 4096  }
  0x52   : > { %618 = vsyncadd (%p977_p6), %s165_s19, 4294963200  ;;  %s441_s23 = sshll.u32 %s815_s30, 7  ;;  %s174_s3 = scalar_lea.sflag [#allocation6], %s815_s30 }
  0x53   : > { %s827_s5 = scalar_lea.vmem [#allocation5], %s441_s23 }
  0x54   : > { %620 = dma.done.wait (%p977_p6), %s174_s3, 2048  }
  0x55   : > { %622 = vsyncadd (%p977_p6), %s174_s3, 4294965248  ;;  %v206_v0 = vld [vmem:[%s827_s5] sm:$0xff]  ;;  %v223_v2 = vld [vmem:[%s819_s24 + $0x8] sm:$0xff]  ;;  %s842_s20 = scalar_lea.vmem [#allocation7], %s440_s4  ;;  %s453_s8 = sshll.u32 %s688_s13, 12 }
  0x56   : > { %v222_v1 = vld [vmem:[%s819_s24] sm:$0xff]  ;;  %v255_v4 = vadd.f32 %v223_v2, %v206_v0  ;;  %v207_v5 = vld [vmem:[%s827_s5 + $0x8] sm:$0xff]  ;;  %v224_v6 = vld [vmem:[%s819_s24 + $0x10] sm:$0xff]  ;;  %s333_s17 = sshll.u32 %s842_s20, 4  ;;  %s914_s25 = scalar_lea.hbm %s968_s2, %s453_s8  ;;  %s916_s17 = int_to_ptr.vmem [resolvable:$true] %s333_s17 }
  0x57   : > { %v254_v3 = vadd.f32 %v222_v1, %v206_v0  ;;  %v225_v7 = vld [vmem:[%s819_s24 + $0x18] sm:$0xff]  ;;  %v256_v8 = vadd.f32 %v224_v6, %v207_v5  ;;  %v208_v10 = vld [vmem:[%s827_s5 + $0x10] sm:$0xff]  ;;  %v226_v11 = vld [vmem:[%s819_s24 + $0x20] sm:$0xff]  ;;  %s319_s26 = scalar_lea.sflag [#allocation4], %s815_s30  ;;  %s571_s27 = scalar_lea.vmem %s916_s17, 4096 }
  0x58   : > { %v257_v9 = vadd.f32 %v225_v7, %v207_v5  ;;  %v227_v12 = vld [vmem:[%s819_s24 + $0x28] sm:$0xff]  ;;  %287 = vst [vmem:[%s842_s20 + $0x8] sm:$0xff] %v255_v4  ;;  %v258_v13 = vadd.f32 %v226_v11, %v208_v10  ;;  %v209_v15 = vld [vmem:[%s827_s5 + $0x18] sm:$0xff]  ;;  %v228_v16 = vld [vmem:[%s819_s24 + $0x30] sm:$0xff]  ;;  %p572_p13 = scmp.ne.s32.totalorder %s916_s17, %s571_s27  ;;  %p978_p1 = scmp.ne.s32.totalorder %s973_s21, 0 }
  0x59   : > { %286 = vst [vmem:[%s842_s20] sm:$0xff] %v254_v3  ;;  %v259_v14 = vadd.f32 %v227_v12, %v208_v10  ;;  %v229_v17 = vld [vmem:[%s819_s24 + $0x38] sm:$0xff]  ;;  %288 = vst [vmem:[%s842_s20 + $0x10] sm:$0xff] %v256_v8  ;;  %v260_v18 = vadd.f32 %v228_v16, %v209_v15  ;;  %v210_v20 = vld [vmem:[%s827_s5 + $0x20] sm:$0xff]  ;;  %s649_s29 = smov [#allocation7]  }
  0x5a   : > { %289 = vst [vmem:[%s842_s20 + $0x18] sm:$0xff] %v257_v9  ;;  %v261_v19 = vadd.f32 %v229_v17, %v209_v15  ;;  %v230_v21 = vld [vmem:[%s819_s24 + $0x40] sm:$0xff]  ;;  %v231_v22 = vld [vmem:[%s819_s24 + $0x48] sm:$0xff]  ;;  %290 = vst [vmem:[%s842_s20 + $0x20] sm:$0xff] %v258_v13  ;;  %p573_p11 = pnand %p572_p13, %p978_p1  ;;  %s575_s6 = sshll.u32 %s649_s29, 4  ;;  %s576_s6 = int_to_ptr.vmem [resolvable:$false] %s575_s6 }
  0x5b   : > { %291 = vst [vmem:[%s842_s20 + $0x28] sm:$0xff] %v259_v14  ;;  %v262_v23 = vadd.f32 %v230_v21, %v210_v20  ;;  %v263_v24 = vadd.f32 %v231_v22, %v210_v20  ;;  %v211_v25 = vld [vmem:[%s827_s5 + $0x28] sm:$0xff]  ;;  %v232_v26 = vld [vmem:[%s819_s24 + $0x50] sm:$0xff]  ;;  %v233_v27 = vld [vmem:[%s819_s24 + $0x58] sm:$0xff]  ;;  %s577_s7 = scalar_lea.vmem %s576_s6, 8192  ;;  %p578_p5 = scmp.lt.s32.totalorder %s916_s17, %s576_s6 }
  0x5c   : > { %292 = vst [vmem:[%s842_s20 + $0x30] sm:$0xff] %v260_v18  ;;  %293 = vst [vmem:[%s842_s20 + $0x38] sm:$0xff] %v261_v19  ;;  %v264_v28 = vadd.f32 %v232_v26, %v211_v25  ;;  %v265_v29 = vadd.f32 %v233_v27, %v211_v25  ;;  %v212_v30 = vld [vmem:[%s827_s5 + $0x30] sm:$0xff]  ;;  %v234_v31 = vld [vmem:[%s819_s24 + $0x60] sm:$0xff]  ;;  %p574_p10 = pneg %p573_p11  ;;  %p579_p7 = scmp.lt.s32.totalorder %s577_s7, %s571_s27 }
  0x5d   : > { %v235_v32 = vld [vmem:[%s819_s24 + $0x68] sm:$0xff]  ;;  %294 = vst [vmem:[%s842_s20 + $0x40] sm:$0xff] %v262_v23  ;;  %295 = vst [vmem:[%s842_s20 + $0x48] sm:$0xff] %v263_v24  ;;  %v266_v33 = vadd.f32 %v234_v31, %v212_v30  ;;  %v213_v35 = vld [vmem:[%s827_s5 + $0x38] sm:$0xff] }
  0x5e   : > { %v267_v34 = vadd.f32 %v235_v32, %v212_v30  ;;  %v236_v36 = vld [vmem:[%s819_s24 + $0x70] sm:$0xff]  ;;  %v237_v37 = vld [vmem:[%s819_s24 + $0x78] sm:$0xff]  ;;  %296 = vst [vmem:[%s842_s20 + $0x50] sm:$0xff] %v264_v28  ;;  %297 = vst [vmem:[%s842_s20 + $0x58] sm:$0xff] %v265_v29  ;;  %p580_p9 = por %p579_p7, %p578_p5 }
  0x5f   : > { %v268_v38 = vadd.f32 %v236_v36, %v213_v35  ;;  %v269_v39 = vadd.f32 %v237_v37, %v213_v35  ;;  %v214_v40 = vld [vmem:[%s827_s5 + $0x40] sm:$0xff]  ;;  %v239_v42 = vld [vmem:[%s819_s24 + $0x88] sm:$0xff]  ;;  %298 = vst [vmem:[%s842_s20 + $0x60] sm:$0xff] %v266_v33  ;;  %v240_v46 = vld [vmem:[%s819_s24 + $0x90] sm:$0xff] }
  0x60   : > { %v238_v41 = vld [vmem:[%s819_s24 + $0x80] sm:$0xff]  ;;  %299 = vst [vmem:[%s842_s20 + $0x68] sm:$0xff] %v267_v34  ;;  %v271_v44 = vadd.f32 %v239_v42, %v214_v40  ;;  %v215_v45 = vld [vmem:[%s827_s5 + $0x48] sm:$0xff]  ;;  %v241_v47 = vld [vmem:[%s819_s24 + $0x98] sm:$0xff]  ;;  %p581_p3 = pnand %p580_p9, %p574_p10 }
  0x61   : > { %v270_v43 = vadd.f32 %v238_v41, %v214_v40  ;;  %300 = vst [vmem:[%s842_s20 + $0x70] sm:$0xff] %v268_v38  ;;  %301 = vst [vmem:[%s842_s20 + $0x78] sm:$0xff] %v269_v39  ;;  %v272_v48 = vadd.f32 %v240_v46, %v215_v45  ;;  %v273_v49 = vadd.f32 %v241_v47, %v215_v45  ;;  %v216_v50 = vld [vmem:[%s827_s5 + $0x50] sm:$0xff]  ;;  %v242_v51 = vld [vmem:[%s819_s24 + $0xa0] sm:$0xff] }
  0x62   : > { %v243_v52 = vld [vmem:[%s819_s24 + $0xa8] sm:$0xff]  ;;  %303 = vst [vmem:[%s842_s20 + $0x88] sm:$0xff] %v271_v44  ;;  %v274_v53 = vadd.f32 %v242_v51, %v216_v50  ;;  %v217_v55 = vld [vmem:[%s827_s5 + $0x58] sm:$0xff]  ;;  %v244_v56 = vld [vmem:[%s819_s24 + $0xb0] sm:$0xff] }
  0x63   : > { %302 = vst [vmem:[%s842_s20 + $0x80] sm:$0xff] %v270_v43  ;;  %v275_v54 = vadd.f32 %v243_v52, %v216_v50  ;;  %v245_v57 = vld [vmem:[%s819_s24 + $0xb8] sm:$0xff]  ;;  %304 = vst [vmem:[%s842_s20 + $0x90] sm:$0xff] %v272_v48  ;;  %v276_v58 = vadd.f32 %v244_v56, %v217_v55  ;;  %v218_v60 = vld [vmem:[%s827_s5 + $0x60] sm:$0xff] }
  0x64   : > { %305 = vst [vmem:[%s842_s20 + $0x98] sm:$0xff] %v273_v49  ;;  %v277_v59 = vadd.f32 %v245_v57, %v217_v55  ;;  %v246_v61 = vld [vmem:[%s819_s24 + $0xc0] sm:$0xff]  ;;  %v247_v62 = vld [vmem:[%s819_s24 + $0xc8] sm:$0xff]  ;;  %306 = vst [vmem:[%s842_s20 + $0xa0] sm:$0xff] %v274_v53 }
  0x65   : > { %307 = vst [vmem:[%s842_s20 + $0xa8] sm:$0xff] %v275_v54  ;;  %v278_v63 = vadd.f32 %v246_v61, %v218_v60  ;;  %v279_v0 = vadd.f32 %v247_v62, %v218_v60  ;;  %v219_v1 = vld [vmem:[%s827_s5 + $0x68] sm:$0xff]  ;;  %v248_v2 = vld [vmem:[%s819_s24 + $0xd0] sm:$0xff]  ;;  %v249_v3 = vld [vmem:[%s819_s24 + $0xd8] sm:$0xff] }
  0x66   : > { %308 = vst [vmem:[%s842_s20 + $0xb0] sm:$0xff] %v276_v58  ;;  %309 = vst [vmem:[%s842_s20 + $0xb8] sm:$0xff] %v277_v59  ;;  %v280_v4 = vadd.f32 %v248_v2, %v219_v1  ;;  %v281_v5 = vadd.f32 %v249_v3, %v219_v1  ;;  %v220_v6 = vld [vmem:[%s827_s5 + $0x70] sm:$0xff]  ;;  %v250_v7 = vld [vmem:[%s819_s24 + $0xe0] sm:$0xff] }
  0x67   : > { %v251_v8 = vld [vmem:[%s819_s24 + $0xe8] sm:$0xff]  ;;  %310 = vst [vmem:[%s842_s20 + $0xc0] sm:$0xff] %v278_v63  ;;  %311 = vst [vmem:[%s842_s20 + $0xc8] sm:$0xff] %v279_v0  ;;  %v282_v9 = vadd.f32 %v250_v7, %v220_v6  ;;  %v221_v11 = vld [vmem:[%s827_s5 + $0x78] sm:$0xff] }
  0x68   : > { %v283_v10 = vadd.f32 %v251_v8, %v220_v6  ;;  %v252_v12 = vld [vmem:[%s819_s24 + $0xf0] sm:$0xff]  ;;  %v253_v13 = vld [vmem:[%s819_s24 + $0xf8] sm:$0xff]  ;;  %312 = vst [vmem:[%s842_s20 + $0xd0] sm:$0xff] %v280_v4  ;;  %313 = vst [vmem:[%s842_s20 + $0xd8] sm:$0xff] %v281_v5 }
  0x69   : > { %v284_v14 = vadd.f32 %v252_v12, %v221_v11  ;;  %v285_v15 = vadd.f32 %v253_v13, %v221_v11  ;;  %314 = vst [vmem:[%s842_s20 + $0xe0] sm:$0xff] %v282_v9 }
  0x6a   : > { %315 = vst [vmem:[%s842_s20 + $0xe8] sm:$0xff] %v283_v10 }
  0x6b   : > { %316 = vst [vmem:[%s842_s20 + $0xf0] sm:$0xff] %v284_v14  ;;  %317 = vst [vmem:[%s842_s20 + $0xf8] sm:$0xff] %v285_v15 }
  0x6c   : > { %584 = shalt.err (!%p581_p3)
}
  0x6d   : > { %s585_s14 = scalar_lea.hbm %s914_s25, 4096  ;;  %s589_s19 = scalar_lea.hbm %s968_s2, 8192 }
  0x6e   : > { %p586_p12 = scmp.ne.s32.totalorder %s914_s25, %s585_s14  ;;  %p590_p2 = scmp.lt.u32.totalorder %s914_s25, %s968_s2 }
  0x6f   : > { %p591_p4 = scmp.lt.u32.totalorder %s589_s19, %s585_s14  ;;  %p593_p13 = scmp.lt.u32.totalorder %s585_s14, %s914_s25 }
  0x70   : > { %p587_p8 = pnand %p586_p12, %p978_p1 }
  0x71   : > { %p592_p6 = por %p591_p4, %p590_p2 }
  0x72   : > { %p588_p0 = pneg %p587_p8 }
  0x73   : > { %p594_p11 = por %p593_p13, %p592_p6 }
  0x75   : > { %p595_p10 = pnand %p594_p11, %p588_p0 }
  0x77   : > { %598 = shalt.err (!%p595_p10)
}
  0x78   : > { %s650_s3 = smov 256   ;;  %s651_s5 = smov 16  }
  0x79   : > { %458 = dma.vmem_to_hbm [thread:$0]  (%p978_p1), %s916_s17, 4096, %s914_s25, %s319_s26, %s650_s3, %s650_s3, %s651_s5  }
  0x7a PF: > { %s348_s20 = sand.u32 1, %s629_s9   ;;  %p979_p5 = scmp.ne.s32.totalorder %s974_s22, 0 }
  0x7b   : > { %p980_p7 = scmp.ge.s32.totalorder %s641_s12, 2  ;;  %s349_s8 = scalar_lea.sflag [#allocation4], %s348_s20 }
  0x7d   : > { %p468_p9 = pnand %p980_p7, %p979_p5 }
  0x7f   : > { %624 = dma.done.wait (!%p468_p9), %s349_s8, 4096  }
  0x80   : > { %626 = vsyncadd (!%p468_p9), %s349_s8, 4294963200  ;;  %p18_p3 = scmp.ge.s32.totalorder %s692_s15, 4   ;;  %s981_s9 = smov %s633_s10 }
  0x81   : > { %s982_s10 = smov %s637_s11  ;;  %s983_s11 = smov %s704_s18 }
  0x82   : > { %s984_s12 = smov %s692_s15  ;;  %20 = sbr.rel (!%p18_p3) target bundleno = 7 (0x7), region = 86 }
  0x89   :  { %354 = vsyncpa [#allocation3], 1 }
  0x8a   :  { %356 = vsyncpa [#allocation3 + $0x1], 1 }
  0x8b   :  { %357 = vsyncpa [#allocation6], 1 }
  0x8c   :  { %359 = vsyncpa [#allocation6 + $0x1], 1 }
  0x8d   :  { %360 = vsyncpa [#allocation4], 1 }
  0x8e   :  { %362 = vsyncpa [#allocation4 + $0x1], 1 }

</bundles_post_ra>
